<compile_context>
chip_gen: v5e
topology: v5e:2x2
jax: 0.10.0
libtpu: 0.0.40
codegen_flags: <defaults>
</compile_context>

<pallas_src>
from typing import NamedTuple

import jax
import jax.numpy as jnp
from jax import lax
from jax.experimental import pallas as pl
from jax.experimental.pallas import tpu as pltpu

_COMPUTE_DTYPE = jnp.bfloat16
_VMEM_BUDGET = 40 * 1024 * 1024    # planning budget (headroom under v7x's 64 MiB)
_VMEM_LIMIT = 48 * 1024 * 1024     # scoped-VMEM limit handed to Mosaic


def _round_up(x, m):
    return ((x + m - 1) // m) * m


class FCParams(NamedTuple):
    w_t: jax.Array   # (k_pad, n_pad) bf16 -- BN-folded, transposed, padded weight
    b: jax.Array     # (1, n_pad)   f32    -- BN-folded, padded bias
    n_inp: int
    n_out: int


def prepare_fc_params(weight, bias, gamma, beta, running_mean, running_var,
                      eps=1e-5):
    """One-time parameter prep: fold eval-mode BN into W/b, pad, transpose, cast.

    weight: (n_out, n_inp)  (PyTorch nn.Linear layout)
    bias:   (n_out,) or (1, n_out)
    gamma/beta/running_mean/running_var: (n_inp,) or (1, n_inp)
    """
    f32 = jnp.float32
    n_out, n_inp = weight.shape
    w = jnp.asarray(weight, f32)
    b = jnp.asarray(bias, f32).reshape(1, n_out)
    g = jnp.asarray(gamma, f32).reshape(1, n_inp)
    bt = jnp.asarray(beta, f32).reshape(1, n_inp)
    mu = jnp.asarray(running_mean, f32).reshape(1, n_inp)
    var = jnp.asarray(running_var, f32).reshape(1, n_inp)

    s = g * lax.rsqrt(var + eps)        # (1, K)
    t = bt - mu * s                     # (1, K)
    w_folded = w * s                    # (N, K): W'[n,k] = W[n,k] * s[k]
    b_folded = b + t @ w.T              # (1, N): b'      = b + t @ W^T

    k_pad = _round_up(n_inp, 128)
    n_pad = _round_up(n_out, 256) if n_out > 128 else _round_up(n_out, 128)

    w_t = jnp.zeros((k_pad, n_pad), _COMPUTE_DTYPE)
    w_t = w_t.at[:n_inp, :n_out].set(w_folded.T.astype(_COMPUTE_DTYPE))
    b_p = jnp.zeros((1, n_pad), f32).at[:, :n_out].set(b_folded)
    return FCParams(w_t=w_t, b=b_p, n_inp=n_inp, n_out=n_out)


# ---------------------------------------------------------------------------
# Kernels
# ---------------------------------------------------------------------------
def _fc_kernel_resident(x_ref, w_ref, b_ref, o_ref):
    # Whole K resident: y = ReLU(x @ W' + b'); BN already folded into W'/b'.
    y = jnp.dot(x_ref[...], w_ref[...], preferred_element_type=jnp.float32)
    o_ref[...] = jnp.maximum(y + b_ref[...], 0.0)


def _fc_kernel_ktiled(x_ref, w_ref, b_ref, o_ref, acc_ref):
    # K tiled over the last ("arbitrary") grid axis with an f32 accumulator.
    k = pl.program_id(1)

    @pl.when(k == 0)
    def _():
        acc_ref[...] = jnp.zeros_like(acc_ref)

    acc_ref[...] += jnp.dot(x_ref[...], w_ref[...],
                            preferred_element_type=jnp.float32)

    @pl.when(k == pl.num_programs(1) - 1)
    def _():
        o_ref[...] = jnp.maximum(acc_ref[...] + b_ref[...], 0.0)


# ---------------------------------------------------------------------------
# Tiling plan
# ---------------------------------------------------------------------------
def _plan_tiling(B, k_pad, n_pad):
    """Return (k_resident, tb, tk); counts 2x for every double-buffered operand."""
    bx = jnp.dtype(_COMPUTE_DTYPE).itemsize  # bf16 = 2 bytes
    tb_max = max(16, _round_up(B, 16))
    tb_candidates = [c for c in (1024, 512, 256, 128, 64, 32, 16) if c <= tb_max]
    if not tb_candidates:
        tb_candidates = [16]

    def resident_bytes(tb):
        return (2 * tb * k_pad * bx          # x tile (double-buffered)
                + 2 * k_pad * n_pad * bx     # resident weight (counted 2x)
                + 2 * n_pad * 4              # bias
                + 2 * tb * n_pad * 4)        # output tile

    def ktiled_bytes(tb, tk):
        return (2 * tb * tk * bx
                + 2 * tk * n_pad * bx
                + 2 * n_pad * 4
                + 2 * tb * n_pad * 4
                + tb * n_pad * 4)            # f32 accumulator scratch

    for tb in tb_candidates:
        if resident_bytes(tb) <= _VMEM_BUDGET:
            return True, tb, k_pad

    m = k_pad // 128
    tk_candidates = [d * 128 for d in range(m, 0, -1) if m % d == 0]
    for tb in tb_candidates:
        for tk in tk_candidates:
            if ktiled_bytes(tb, tk) <= _VMEM_BUDGET:
                return False, tb, tk
    return False, 16, 128


def _cap_for_two_steps(B, tb):
    # Keep >= 2 batch-grid steps when B is big enough so the "parallel" axis
    # can shard across v7x's two TensorCores (harmless on v5e/v6e).
    if B >= 256 and _round_up(B, tb) // tb < 2:
        tb = min(tb, max(128, _round_up(pl.cdiv(B, 2), 16)))
    return tb


# ---------------------------------------------------------------------------
# Forward
# ---------------------------------------------------------------------------
def fc_forward(x, params: FCParams):
    """y = ReLU(BN(x) @ W^T + b) using cached folded/padded parameters."""
    B, n_inp = x.shape
    assert n_inp == params.n_inp
    k_pad, n_pad = params.w_t.shape
    n_out = params.n_out

    resident, tb, tk = _plan_tiling(B, k_pad, n_pad)
    tb = _cap_for_two_steps(B, tb)
    b_pad = _round_up(B, tb)

    # Pad/cast x only when needed (skip entirely for aligned bf16 inputs).
    if x.shape == (b_pad, k_pad) and x.dtype == _COMPUTE_DTYPE:
        x_p = x
    else:
        x_p = jnp.zeros((b_pad, k_pad), _COMPUTE_DTYPE)
        x_p = x_p.at[:B, :n_inp].set(x.astype(_COMPUTE_DTYPE))

    if resident:
        out = pl.pallas_call(
            _fc_kernel_resident,
            out_shape=jax.ShapeDtypeStruct((b_pad, n_pad), jnp.float32),
            grid=(b_pad // tb,),
            in_specs=[
                pl.BlockSpec((tb, k_pad), lambda i: (i, 0)),     # x tile
                pl.BlockSpec((k_pad, n_pad), lambda i: (0, 0)),  # folded W^T (resident)
                pl.BlockSpec((1, n_pad), lambda i: (0, 0)),      # folded bias
            ],
            out_specs=pl.BlockSpec((tb, n_pad), lambda i: (i, 0)),
            compiler_params=pltpu.CompilerParams(
                dimension_semantics=("parallel",),
                vmem_limit_bytes=_VMEM_LIMIT),
        )(x_p, params.w_t, params.b)
    else:
        out = pl.pallas_call(
            _fc_kernel_ktiled,
            out_shape=jax.ShapeDtypeStruct((b_pad, n_pad), jnp.float32),
            grid=(b_pad // tb, k_pad // tk),
            in_specs=[
                pl.BlockSpec((tb, tk), lambda i, k: (i, k)),
                pl.BlockSpec((tk, n_pad), lambda i, k: (k, 0)),
                pl.BlockSpec((1, n_pad), lambda i, k: (0, 0)),
            ],
            out_specs=pl.BlockSpec((tb, n_pad), lambda i, k: (i, 0)),
            scratch_shapes=[pltpu.VMEM((tb, n_pad), jnp.float32)],
            compiler_params=pltpu.CompilerParams(
                dimension_semantics=("parallel", "arbitrary"),
                vmem_limit_bytes=_VMEM_LIMIT),
        )(x_p, params.w_t, params.b)

    if (b_pad, n_pad) != (B, n_out):
        out = out[:B, :n_out]
    return out


def fc_reference(x, gamma, beta, running_mean, running_var, weight, bias,
                 eps=1e-5):
    x_norm = (x - running_mean) / jnp.sqrt(running_var + eps) * gamma + beta
    y = x_norm @ weight.T + bias
    return jnp.maximum(y, 0.0)


if __name__ == "__main__":
    B, n_inp, n_out = 8, 32, 64

    key = jax.random.PRNGKey(0)
    kx, kw, kb, kg, kbt, km, kv = jax.random.split(key, 7)

    x = jax.random.normal(kx, (B, n_inp), dtype=jnp.float32)

    # Deterministic synthetic parameters (eval-mode BN statistics).
    weight = jax.random.normal(kw, (n_out, n_inp), dtype=jnp.float32) * 0.1
    bias = jax.random.normal(kb, (n_out,), dtype=jnp.float32) * 0.1
    gamma = 1.0 + 0.1 * jax.random.normal(kg, (n_inp,), dtype=jnp.float32)
    beta = 0.1 * jax.random.normal(kbt, (n_inp,), dtype=jnp.float32)
    running_mean = 0.1 * jax.random.normal(km, (n_inp,), dtype=jnp.float32)
    running_var = jnp.abs(
        1.0 + 0.1 * jax.random.normal(kv, (n_inp,), dtype=jnp.float32))

    # Parameters are folded/padded/cast ONCE and cached; per-call work is x only.
    params = prepare_fc_params(weight, bias, gamma, beta, running_mean,
                               running_var)

    out = fc_forward(x, params)
    out = jax.block_until_ready(out)

    ref = fc_reference(x, gamma, beta, running_mean, running_var, weight, bias)
    assert out.shape == (B, n_out)
    # bf16 MXU operands with f32 accumulation -> wider tolerance than pure f32.
    assert jnp.allclose(out, ref, atol=5e-2, rtol=5e-2), "mismatch vs reference"

    print("KERNEL_OK")
</pallas_src>

<mosaic_0001>
module attributes {stable_mosaic.version = 11 : i64} {
  func.func @_fc_kernel_resident(%arg0: i32, %arg1: memref<16x128xbf16, #tpu.memory_space<vmem>>, %arg2: memref<128x128xbf16, #tpu.memory_space<vmem>>, %arg3: memref<1x128xf32, #tpu.memory_space<vmem>>, %arg4: memref<16x128xf32, #tpu.memory_space<vmem>>) attributes {dimension_semantics = [#tpu.dimension_semantics<parallel>], iteration_bounds = array<i64: 1>, scalar_prefetch = 0 : i64, scratch_operands = 0 : i64, tpu.core_type = #tpu.core_type<tc>, window_params = [{transform_indices = @transform_0, window_bounds = array<i64: 16, 128>}, {pipeline_mode = #tpu.pipeline_mode<synchronous>, transform_indices = @transform_1, window_bounds = array<i64: 128, 128>}, {pipeline_mode = #tpu.pipeline_mode<synchronous>, transform_indices = @transform_2, window_bounds = array<i64: 1, 128>}, {transform_indices = @transform_3, window_bounds = array<i64: 16, 128>}]} {
    %c0 = arith.constant 0 : index
    %c0_0 = arith.constant 0 : index
    %0 = vector.load %arg1[%c0, %c0_0] : memref<16x128xbf16, #tpu.memory_space<vmem>>, vector<16x128xbf16>
    %c0_1 = arith.constant 0 : index
    %c0_2 = arith.constant 0 : index
    %1 = vector.load %arg2[%c0_1, %c0_2] : memref<128x128xbf16, #tpu.memory_space<vmem>>, vector<128x128xbf16>
    %cst = arith.constant dense<0.000000e+00> : vector<16x128xf32>
    %2 = tpu.matmul %0, %1, %cst {dimension_numbers = #tpu.dot_dimension_numbers<[1], [0], [0], [1], [0, 0, 1, 1], [], []>} : vector<16x128xbf16>, vector<128x128xbf16>, vector<16x128xf32> -> vector<16x128xf32>
    %c0_3 = arith.constant 0 : index
    %c0_4 = arith.constant 0 : index
    %3 = vector.load %arg3[%c0_3, %c0_4] : memref<1x128xf32, #tpu.memory_space<vmem>>, vector<1x128xf32>
    %4 = vector.broadcast %3 : vector<1x128xf32> to vector<16x128xf32>
    %5 = arith.addf %2, %4 : vector<16x128xf32>
    %cst_5 = arith.constant 0.000000e+00 : f32
    %6 = vector.broadcast %cst_5 : f32 to vector<16x128xf32>
    %7 = arith.maximumf %5, %6 : vector<16x128xf32>
    %c0_6 = arith.constant 0 : index
    %c0_7 = arith.constant 0 : index
    %8 = vector.load %arg4[%c0_6, %c0_7] : memref<16x128xf32, #tpu.memory_space<vmem>>, vector<16x128xf32>
    tpu.vector_store %arg4[%c0_6, %c0_7], %7 {strides = array<i32>} : memref<16x128xf32, #tpu.memory_space<vmem>>, vector<16x128xf32>,
    return
  }
  func.func @transform_0(%arg0: i32) -> (i32, i32) {
    %c0_i32 = arith.constant 0 : i32
    %c0_i32_0 = arith.constant 0 : i32
    return %arg0, %c0_i32 : i32, i32
  }
  func.func @transform_1(%arg0: i32) -> (i32, i32) {
    %c0_i32 = arith.constant 0 : i32
    %c0_i32_0 = arith.constant 0 : i32
    %c0_i32_1 = arith.constant 0 : i32
    return %c0_i32, %c0_i32_0 : i32, i32
  }
  func.func @transform_2(%arg0: i32) -> (i32, i32) {
    %c0_i32 = arith.constant 0 : i32
    %c0_i32_0 = arith.constant 0 : i32
    %c0_i32_1 = arith.constant 0 : i32
    return %c0_i32, %c0_i32_0 : i32, i32
  }
  func.func @transform_3(%arg0: i32) -> (i32, i32) {
    %c0_i32 = arith.constant 0 : i32
    %c0_i32_0 = arith.constant 0 : i32
    return %arg0, %c0_i32 : i32, i32
  }
}

</mosaic_0001>

<bundles_post_ra>
// kernel: tpu_custom_call.1
= control target key start
LH: loop header
LB: loop body
LE: loop exit
PB: predicated region body
PF: predicated region fallthrough
CT: control target
= control target key end

     0   :  { %8 = vsyncpa [#allocation3], 0  ;;  %s331_s0 = inlined_call_operand.hbm [shape: bf16[16,128], index: 0, kind: input, shape index: {}]   ;;  %s332_s1 = inlined_call_operand.hbm [shape: bf16[128,128], index: 1, kind: input, shape index: {}]   ;;  %s333_s2 = inlined_call_operand.vmem [shape: f32[1,128], index: 2, kind: input, shape index: {}]   ;;  %s334_s3 = inlined_call_operand.hbm [shape: f32[16,128], index: 3, kind: output, shape index: {}]  }
   0x1   :  { %9 = vsyncpa [#allocation6], 0 }
   0x2   :  { %10 = vsyncpa [#allocation4], 0  ;;  %s15_s14 = sshll.u32 %s331_s0, 4  ;;  %s292_s15 = smov [#allocation2]   ;;  %s16_s14 = int_to_ptr.hbm [resolvable:$true] %s15_s14 }
   0x3   :  { %s17_s16 = sshll.u32 %s292_s15, 4  ;;  %s28_s19 = sshll.u32 %s332_s1, 4  ;;  %s18_s16 = int_to_ptr.vmem [resolvable:$true] %s17_s16  ;;  %s29_s19 = int_to_ptr.hbm [resolvable:$true] %s28_s19 }
   0x4   :  { %s293_s20 = smov 64   ;;  %s294_s21 = smov 4  }
   0x5   :  { %23 = dma.hbm_to_vmem [thread:$0]  %s16_s14, 128, %s18_s16, [#allocation3], %s293_s20, %s293_s20, %s294_s21  }
   0x6   :  { %s295_s22 = smov [#allocation5]  }
   0x7   :  { %s30_s23 = sshll.u32 %s295_s22, 4  ;;  %s31_s23 = int_to_ptr.vmem [resolvable:$true] %s30_s23 }
   0x8   :  { %36 = dma.hbm_to_vmem [thread:$0]  %s29_s19, 1024, %s31_s23, [#allocation6], %s293_s20, %s293_s20, %s294_s21  }
   0x9   :  { %286 = dma.done.wait [#allocation3], 128  }
   0xa   :  { %287 = vsyncadd [#allocation3], 4294967168 }
   0xb   :  { %288 = dma.done.wait [#allocation6], 1024  }
   0xc   :  { %289 = vsyncadd [#allocation6], 4294966272  ;;  %v205_v0 = vld [vmem:[#allocation5 + $0x38] sm:$0xff]  ;;  %v204_v1 = vld [vmem:[#allocation5 + $0x30] sm:$0xff]  ;;  %s296_s24 = smov [#allocation7]   ;;  %s147_s28 = sshll.u32 %s334_s3, 4  ;;  %s148_s28 = int_to_ptr.hbm [resolvable:$true] %s147_s28 }
   0xd   :  { %123 = vmatpush.bf16.msra.mxu0 %v205_v0  ;;  %v203_v2 = vld [vmem:[#allocation5 + $0x28] sm:$0xff]  ;;  %v202_v3 = vld [vmem:[#allocation5 + $0x20] sm:$0xff]  ;;  %v201_v4 = vld [vmem:[#allocation5 + $0x18] sm:$0xff]  ;;  %s145_s25 = sshll.u32 %s296_s24, 4  ;;  %s297_s29 = smov 128   ;;  %s146_s25 = int_to_ptr.vmem [resolvable:$true] %s145_s25 }
   0xe   :  { %v200_v5 = vld [vmem:[#allocation5 + $0x10] sm:$0xff]  ;;  %v199_v6 = vld [vmem:[#allocation5 + $0x8] sm:$0xff]  ;;  %v198_v7 = vld [vmem:[#allocation5] sm:$0xff]  ;;  %s298_s30 = smov 8  }
   0xf   :  { %v197_v8 = vld [vmem:[#allocation2] sm:$0xff] }
  0x10   :  { %v213_v9 = vld [vmem:[%s333_s2] ss:$0 sm:$0xff] }
  0x11   :  { %124 = vmatpush.bf16.msra.mxu0 %v204_v1 }
  0x15   :  { %125 = vmatpush.bf16.msra.mxu0 %v203_v2 }
  0x19   :  { %126 = vmatpush.bf16.msra.mxu0 %v202_v3 }
  0x1d   :  { %127 = vmatpush.bf16.msra.mxu0 %v201_v4 }
  0x21   :  { %128 = vmatpush.bf16.msra.mxu0 %v200_v5 }
  0x25   :  { %129 = vmatpush.bf16.msra.mxu0 %v199_v6 }
  0x29   :  { %130 = vmatpush.bf16.msra.mxu0 %v198_v7 }
  0x2c   :  { %131 = vmatmul.bf16.vlgmr.msra.gmra.mxu0 %v197_v8 }
  0xa9   :  { %v132_v10 = vpop.f32.mrf.mxu0 }
  0xaa   :  { %v133_v11 = vadd.f32 %v213_v9, %v132_v10 }
  0xac   :  { %v137_v12 = vmax.f32 %v133_v11, 0.0 }
  0xae   :  { %139 = vst [vmem:[#allocation7] sm:$0xff] %v137_v12 }
  0xb1   :  { %v134_v13 = vpop.f32.mrf.mxu0 }
  0xb2   :  { %v135_v14 = vadd.f32 %v213_v9, %v134_v13 }
  0xb4   :  { %v138_v15 = vmax.f32 %v135_v14, 0.0 }
  0xb6   :  { %140 = vst [vmem:[#allocation7 + $0x8] sm:$0xff] %v138_v15 }
  0xb7   :  { %153 = dma.vmem_to_hbm [thread:$0]  %s146_s25, 256, %s148_s28, [#allocation4], %s297_s29, %s297_s29, %s298_s30  }
  0xb8   :  { %290 = dma.done.wait [#allocation4], 256  }
  0xb9   :  { %291 = vsyncadd [#allocation4], 4294967040 }
  0xba   :  { %158 = vsyncpa [#allocation3], 1 }
  0xbb   :  { %159 = vsyncpa [#allocation6], 1 }
  0xbc   :  { %160 = vsyncpa [#allocation4], 1 }

</bundles_post_ra>
